<compile_context>
chip_gen: v7x
topology: tpu7x:2x2x1
jax: 0.10.0
libtpu: 0.0.40
codegen_flags: <defaults>
</compile_context>

<pallas_src>
import functools

import jax
import jax.numpy as jnp
from jax import lax
from jax.experimental import pallas as pl
from jax.experimental.pallas import tpu as pltpu

_EPS = 1e-5


# ----------------------------------------------------------------------------
# Pass 1: 3x3 "same" conv (stride 1, pad 1) + per-tile BN partial statistics.
# ----------------------------------------------------------------------------
def _conv3x3_stats_kernel(xp_ref, w_ref, conv_ref, stat_ref):
    # xp_ref   : (1, H+2, W+2, Cin)  padded input image (resident across row tiles)
    # w_ref    : (9, Cin, Cout)      3x3 weights, tap index = kh*3 + kw
    # conv_ref : (1, TR, W, Cout)    pre-BN conv output tile
    # stat_ref : (1, 1, 2, Cout)     per-tile per-channel (sum, sum of squares)
    r = pl.program_id(1)
    _, TR, W, Cout = conv_ref.shape
    Cin = xp_ref.shape[-1]

    row0 = pl.multiple_of(r * TR, TR)
    # halo'd rows for this tile: (1, TR+2, W+2, Cin)
    xt = xp_ref[:, pl.ds(row0, TR + 2), :, :]
    w = w_ref[...]

    # 3x3 conv as 9 shifted channel-matmuls; tap 0 initialises the accumulator.
    # Conv bias omitted on purpose: it cancels exactly through the training-mode
    # BatchNorm mean subtraction applied next.
    acc = jnp.dot(xt[:, 0:TR, 0:W, :].reshape(TR * W, Cin), w[0],
                  preferred_element_type=jnp.float32)
    for t in range(1, 9):
        kh, kw = divmod(t, 3)
        patch = xt[:, kh:kh + TR, kw:kw + W, :].reshape(TR * W, Cin)
        acc = acc + jnp.dot(patch, w[t], preferred_element_type=jnp.float32)

    conv_ref[...] = acc.reshape(1, TR, W, Cout)

    # One-pass BN statistics (f32 accumulation): per-channel sum and sum-of-squares.
    s1 = jnp.sum(acc, axis=0, keepdims=True)          # (1, Cout)
    s2 = jnp.sum(acc * acc, axis=0, keepdims=True)    # (1, Cout)
    stat_ref[...] = jnp.concatenate([s1, s2], axis=0).reshape(1, 1, 2, Cout)


# ----------------------------------------------------------------------------
# Pass 2: folded BatchNorm (single FMA) + activation.
# ----------------------------------------------------------------------------
def _bn_act_kernel(conv_ref, scale_ref, shift_ref, out_ref, *, act):
    y = conv_ref[...] * scale_ref[...] + shift_ref[...]
    if act == "relu":
        y = jnp.maximum(y, 0.0)
    elif act == "sigmoid":
        y = jax.nn.sigmoid(y)
    out_ref[...] = y


def _pick_tile_rows(h, want):
    t = min(want, h)
    while h % t:
        t -= 1
    return t


def conv_block_forward(x_nchw, params, *, act="relu", tile_rows=8):
    """conv_block forward: act(BN(Conv2d 3x3, s=1, p=1)(x)). NCHW in / NCHW out."""
    # TODO(synk): only kernel_size=3, stride=1, padding=1 (the module defaults)
    # are implemented; other conv configurations would need a different halo/grid.
    x = jnp.transpose(x_nchw, (0, 2, 3, 1)).astype(jnp.float32)   # NCHW -> NHWC
    N, H, W, Cin = x.shape
    Cout = params["w"].shape[-1]
    xp = jnp.pad(x, ((0, 0), (1, 1), (1, 1), (0, 0)))             # spatial pad = 1

    tr = _pick_tile_rows(H, tile_rows)
    R = H // tr

    conv_out, stats = pl.pallas_call(
        _conv3x3_stats_kernel,
        out_shape=(
            jax.ShapeDtypeStruct((N, H, W, Cout), jnp.float32),
            jax.ShapeDtypeStruct((N, R, 2, Cout), jnp.float32),
        ),
        grid_spec=pltpu.PrefetchScalarGridSpec(
            num_scalar_prefetch=0,
            grid=(N, R),
            in_specs=[
                # padded image: indexed by batch only -> fetched once per image,
                # resident in VMEM across the inner row-tile axis.
                pl.BlockSpec((1, H + 2, W + 2, Cin), lambda n, r: (n, 0, 0, 0)),
                pl.BlockSpec((9, Cin, Cout), lambda n, r: (0, 0, 0)),
            ],
            out_specs=[
                pl.BlockSpec((1, tr, W, Cout), lambda n, r: (n, r, 0, 0)),
                pl.BlockSpec((1, 1, 2, Cout), lambda n, r: (n, r, 0, 0)),
            ],
        ),
        compiler_params=pltpu.CompilerParams(
            dimension_semantics=("parallel", "arbitrary")),
    )(xp, params["w"])

    # Tiny per-channel reduction + BN fold (training mode: batch mean, biased
    # variance, eps=1e-5).  f32 accumulation; clamp var >= 0 to guard against
    # E[x^2]-E[x]^2 cancellation.
    cnt = jnp.float32(N * H * W)
    mu = jnp.sum(stats[:, :, 0, :], axis=(0, 1)) / cnt
    var = jnp.maximum(jnp.sum(stats[:, :, 1, :], axis=(0, 1)) / cnt - mu * mu, 0.0)
    scale = params["gamma"] * lax.rsqrt(var + _EPS)          # (Cout,)
    shift = params["beta"] - mu * scale                      # (Cout,)

    out_nhwc = pl.pallas_call(
        functools.partial(_bn_act_kernel, act=act),
        out_shape=jax.ShapeDtypeStruct((N, H, W, Cout), jnp.float32),
        grid_spec=pltpu.PrefetchScalarGridSpec(
            num_scalar_prefetch=0,
            grid=(N, R),
            in_specs=[
                pl.BlockSpec((1, tr, W, Cout), lambda n, r: (n, r, 0, 0)),
                pl.BlockSpec((1, Cout), lambda n, r: (0, 0)),
                pl.BlockSpec((1, Cout), lambda n, r: (0, 0)),
            ],
            out_specs=pl.BlockSpec((1, tr, W, Cout), lambda n, r: (n, r, 0, 0)),
        ),
        compiler_params=pltpu.CompilerParams(
            dimension_semantics=("parallel", "arbitrary")),
    )(conv_out, scale.reshape(1, Cout), shift.reshape(1, Cout))

    return jnp.transpose(out_nhwc, (0, 3, 1, 2))              # NHWC -> NCHW


def init_params(key, ch_in, ch_out):
    k_w, k_g, k_b = jax.random.split(key, 3)
    # Conv2d(ch_in, ch_out, 3): torch weight (Cout, Cin, 3, 3) -> (9, Cin, Cout),
    # tap index = kh*3 + kw.  The conv bias is not carried: under the
    # training-mode BatchNorm that follows it is a mathematical no-op.
    w_t = 0.1 * jax.random.normal(k_w, (ch_out, ch_in, 3, 3), jnp.float32)
    w = jnp.transpose(w_t, (2, 3, 1, 0)).reshape(9, ch_in, ch_out)
    gamma = 1.0 + 0.1 * jax.random.normal(k_g, (ch_out,), jnp.float32)
    beta = 0.1 * jax.random.normal(k_b, (ch_out,), jnp.float32)
    return dict(w=w, gamma=gamma, beta=beta)


if __name__ == "__main__":
    key = jax.random.PRNGKey(0)
    k_x, k_p = jax.random.split(key)

    N, C_IN, C_OUT, H, W = 2, 4, 8, 16, 16
    x = jax.random.normal(k_x, (N, C_IN, H, W), jnp.float32)
    params = init_params(k_p, C_IN, C_OUT)

    out = conv_block_forward(x, params, act="relu")
    jax.block_until_ready(out)
    assert out.shape == (N, C_OUT, H, W)
    assert bool(jnp.all(jnp.isfinite(out)))
    print("KERNEL_OK")
</pallas_src>

<mosaic_0001>
module attributes {stable_mosaic.version = 11 : i64} {
  func.func @_conv3x3_stats_kernel(%arg0: i32, %arg1: i32, %arg2: memref<1x18x18x4xf32, #tpu.memory_space<vmem>>, %arg3: memref<9x4x8xf32, #tpu.memory_space<vmem>>, %arg4: memref<1x8x16x8xf32, #tpu.memory_space<vmem>>, %arg5: memref<1x1x2x8xf32, #tpu.memory_space<vmem>>) attributes {dimension_semantics = [#tpu.dimension_semantics<parallel>, #tpu.dimension_semantics<arbitrary>], iteration_bounds = array<i64: 2, 2>, scalar_prefetch = 0 : i64, scratch_operands = 0 : i64, tpu.core_type = #tpu.core_type<tc>, window_params = [{transform_indices = @transform_0, window_bounds = array<i64: 1, 18, 18, 4>}, {pipeline_mode = #tpu.pipeline_mode<synchronous>, transform_indices = @transform_1, window_bounds = array<i64: 9, 4, 8>}, {transform_indices = @transform_2, window_bounds = array<i64: 1, 8, 16, 8>}, {transform_indices = @transform_3, window_bounds = array<i64: 1, 1, 2, 8>}]} {
    %c8_i32 = arith.constant 8 : i32
    %0 = arith.muli %arg1, %c8_i32 : i32
    %1 = tpu.assume_multiple %0, 8 : i32
    %c0 = arith.constant 0 : index
    %2 = arith.index_cast %1 : i32 to index
    %c0_0 = arith.constant 0 : index
    %c0_1 = arith.constant 0 : index
    %3 = vector.load %arg2[%c0, %2, %c0_0, %c0_1] : memref<1x18x18x4xf32, #tpu.memory_space<vmem>>, vector<1x10x18x4xf32>
    %c0_2 = arith.constant 0 : index
    %c0_3 = arith.constant 0 : index
    %c0_4 = arith.constant 0 : index
    %4 = vector.load %arg3[%c0_2, %c0_3, %c0_4] : memref<9x4x8xf32, #tpu.memory_space<vmem>>, vector<9x4x8xf32>
    %5 = vector.extract_strided_slice %3 {offsets = [0, 0, 0, 0], sizes = [1, 8, 16, 4], strides = [1, 1, 1, 1]} : vector<1x10x18x4xf32> to vector<1x8x16x4xf32>
    %6 = vector.shape_cast %5 : vector<1x8x16x4xf32> to vector<128x4xf32>
    %7 = vector.extract_strided_slice %4 {offsets = [0, 0, 0], sizes = [1, 4, 8], strides = [1, 1, 1]} : vector<9x4x8xf32> to vector<1x4x8xf32>
    %8 = vector.shape_cast %7 : vector<1x4x8xf32> to vector<4x8xf32>
    %cst = arith.constant dense<0.000000e+00> : vector<128x8xf32>
    %9 = tpu.matmul %6, %8, %cst {dimension_numbers = #tpu.dot_dimension_numbers<[1], [0], [0], [1], [0, 0, 1, 1], [], []>} : vector<128x4xf32>, vector<4x8xf32>, vector<128x8xf32> -> vector<128x8xf32>
    %10 = vector.extract_strided_slice %3 {offsets = [0, 0, 1, 0], sizes = [1, 8, 16, 4], strides = [1, 1, 1, 1]} : vector<1x10x18x4xf32> to vector<1x8x16x4xf32>
    %11 = vector.shape_cast %10 : vector<1x8x16x4xf32> to vector<128x4xf32>
    %12 = vector.extract_strided_slice %4 {offsets = [1, 0, 0], sizes = [1, 4, 8], strides = [1, 1, 1]} : vector<9x4x8xf32> to vector<1x4x8xf32>
    %13 = vector.shape_cast %12 : vector<1x4x8xf32> to vector<4x8xf32>
    %cst_5 = arith.constant dense<0.000000e+00> : vector<128x8xf32>
    %14 = tpu.matmul %11, %13, %cst_5 {dimension_numbers = #tpu.dot_dimension_numbers<[1], [0], [0], [1], [0, 0, 1, 1], [], []>} : vector<128x4xf32>, vector<4x8xf32>, vector<128x8xf32> -> vector<128x8xf32>
    %15 = arith.addf %9, %14 : vector<128x8xf32>
    %16 = vector.extract_strided_slice %3 {offsets = [0, 0, 2, 0], sizes = [1, 8, 16, 4], strides = [1, 1, 1, 1]} : vector<1x10x18x4xf32> to vector<1x8x16x4xf32>
    %17 = vector.shape_cast %16 : vector<1x8x16x4xf32> to vector<128x4xf32>
    %18 = vector.extract_strided_slice %4 {offsets = [2, 0, 0], sizes = [1, 4, 8], strides = [1, 1, 1]} : vector<9x4x8xf32> to vector<1x4x8xf32>
    %19 = vector.shape_cast %18 : vector<1x4x8xf32> to vector<4x8xf32>
    %cst_6 = arith.constant dense<0.000000e+00> : vector<128x8xf32>
    %20 = tpu.matmul %17, %19, %cst_6 {dimension_numbers = #tpu.dot_dimension_numbers<[1], [0], [0], [1], [0, 0, 1, 1], [], []>} : vector<128x4xf32>, vector<4x8xf32>, vector<128x8xf32> -> vector<128x8xf32>
    %21 = arith.addf %15, %20 : vector<128x8xf32>
    %22 = vector.extract_strided_slice %3 {offsets = [0, 1, 0, 0], sizes = [1, 8, 16, 4], strides = [1, 1, 1, 1]} : vector<1x10x18x4xf32> to vector<1x8x16x4xf32>
    %23 = vector.shape_cast %22 : vector<1x8x16x4xf32> to vector<128x4xf32>
    %24 = vector.extract_strided_slice %4 {offsets = [3, 0, 0], sizes = [1, 4, 8], strides = [1, 1, 1]} : vector<9x4x8xf32> to vector<1x4x8xf32>
    %25 = vector.shape_cast %24 : vector<1x4x8xf32> to vector<4x8xf32>
    %cst_7 = arith.constant dense<0.000000e+00> : vector<128x8xf32>
    %26 = tpu.matmul %23, %25, %cst_7 {dimension_numbers = #tpu.dot_dimension_numbers<[1], [0], [0], [1], [0, 0, 1, 1], [], []>} : vector<128x4xf32>, vector<4x8xf32>, vector<128x8xf32> -> vector<128x8xf32>
    %27 = arith.addf %21, %26 : vector<128x8xf32>
    %28 = vector.extract_strided_slice %3 {offsets = [0, 1, 1, 0], sizes = [1, 8, 16, 4], strides = [1, 1, 1, 1]} : vector<1x10x18x4xf32> to vector<1x8x16x4xf32>
    %29 = vector.shape_cast %28 : vector<1x8x16x4xf32> to vector<128x4xf32>
    %30 = vector.extract_strided_slice %4 {offsets = [4, 0, 0], sizes = [1, 4, 8], strides = [1, 1, 1]} : vector<9x4x8xf32> to vector<1x4x8xf32>
    %31 = vector.shape_cast %30 : vector<1x4x8xf32> to vector<4x8xf32>
    %cst_8 = arith.constant dense<0.000000e+00> : vector<128x8xf32>
    %32 = tpu.matmul %29, %31, %cst_8 {dimension_numbers = #tpu.dot_dimension_numbers<[1], [0], [0], [1], [0, 0, 1, 1], [], []>} : vector<128x4xf32>, vector<4x8xf32>, vector<128x8xf32> -> vector<128x8xf32>
    %33 = arith.addf %27, %32 : vector<128x8xf32>
    %34 = vector.extract_strided_slice %3 {offsets = [0, 1, 2, 0], sizes = [1, 8, 16, 4], strides = [1, 1, 1, 1]} : vector<1x10x18x4xf32> to vector<1x8x16x4xf32>
    %35 = vector.shape_cast %34 : vector<1x8x16x4xf32> to vector<128x4xf32>
    %36 = vector.extract_strided_slice %4 {offsets = [5, 0, 0], sizes = [1, 4, 8], strides = [1, 1, 1]} : vector<9x4x8xf32> to vector<1x4x8xf32>
    %37 = vector.shape_cast %36 : vector<1x4x8xf32> to vector<4x8xf32>
    %cst_9 = arith.constant dense<0.000000e+00> : vector<128x8xf32>
    %38 = tpu.matmul %35, %37, %cst_9 {dimension_numbers = #tpu.dot_dimension_numbers<[1], [0], [0], [1], [0, 0, 1, 1], [], []>} : vector<128x4xf32>, vector<4x8xf32>, vector<128x8xf32> -> vector<128x8xf32>
    %39 = arith.addf %33, %38 : vector<128x8xf32>
    %40 = vector.extract_strided_slice %3 {offsets = [0, 2, 0, 0], sizes = [1, 8, 16, 4], strides = [1, 1, 1, 1]} : vector<1x10x18x4xf32> to vector<1x8x16x4xf32>
    %41 = vector.shape_cast %40 : vector<1x8x16x4xf32> to vector<128x4xf32>
    %42 = vector.extract_strided_slice %4 {offsets = [6, 0, 0], sizes = [1, 4, 8], strides = [1, 1, 1]} : vector<9x4x8xf32> to vector<1x4x8xf32>
    %43 = vector.shape_cast %42 : vector<1x4x8xf32> to vector<4x8xf32>
    %cst_10 = arith.constant dense<0.000000e+00> : vector<128x8xf32>
    %44 = tpu.matmul %41, %43, %cst_10 {dimension_numbers = #tpu.dot_dimension_numbers<[1], [0], [0], [1], [0, 0, 1, 1], [], []>} : vector<128x4xf32>, vector<4x8xf32>, vector<128x8xf32> -> vector<128x8xf32>
    %45 = arith.addf %39, %44 : vector<128x8xf32>
    %46 = vector.extract_strided_slice %3 {offsets = [0, 2, 1, 0], sizes = [1, 8, 16, 4], strides = [1, 1, 1, 1]} : vector<1x10x18x4xf32> to vector<1x8x16x4xf32>
    %47 = vector.shape_cast %46 : vector<1x8x16x4xf32> to vector<128x4xf32>
    %48 = vector.extract_strided_slice %4 {offsets = [7, 0, 0], sizes = [1, 4, 8], strides = [1, 1, 1]} : vector<9x4x8xf32> to vector<1x4x8xf32>
    %49 = vector.shape_cast %48 : vector<1x4x8xf32> to vector<4x8xf32>
    %cst_11 = arith.constant dense<0.000000e+00> : vector<128x8xf32>
    %50 = tpu.matmul %47, %49, %cst_11 {dimension_numbers = #tpu.dot_dimension_numbers<[1], [0], [0], [1], [0, 0, 1, 1], [], []>} : vector<128x4xf32>, vector<4x8xf32>, vector<128x8xf32> -> vector<128x8xf32>
    %51 = arith.addf %45, %50 : vector<128x8xf32>
    %52 = vector.extract_strided_slice %3 {offsets = [0, 2, 2, 0], sizes = [1, 8, 16, 4], strides = [1, 1, 1, 1]} : vector<1x10x18x4xf32> to vector<1x8x16x4xf32>
    %53 = vector.shape_cast %52 : vector<1x8x16x4xf32> to vector<128x4xf32>
    %54 = vector.extract_strided_slice %4 {offsets = [8, 0, 0], sizes = [1, 4, 8], strides = [1, 1, 1]} : vector<9x4x8xf32> to vector<1x4x8xf32>
    %55 = vector.shape_cast %54 : vector<1x4x8xf32> to vector<4x8xf32>
    %cst_12 = arith.constant dense<0.000000e+00> : vector<128x8xf32>
    %56 = tpu.matmul %53, %55, %cst_12 {dimension_numbers = #tpu.dot_dimension_numbers<[1], [0], [0], [1], [0, 0, 1, 1], [], []>} : vector<128x4xf32>, vector<4x8xf32>, vector<128x8xf32> -> vector<128x8xf32>
    %57 = arith.addf %51, %56 : vector<128x8xf32>
    %58 = vector.shape_cast %57 : vector<128x8xf32> to vector<1x8x16x8xf32>
    %c0_13 = arith.constant 0 : index
    %c0_14 = arith.constant 0 : index
    %c0_15 = arith.constant 0 : index
    %c0_16 = arith.constant 0 : index
    %59 = vector.load %arg4[%c0_13, %c0_14, %c0_15, %c0_16] : memref<1x8x16x8xf32, #tpu.memory_space<vmem>>, vector<1x8x16x8xf32>
    tpu.vector_store %arg4[%c0_13, %c0_14, %c0_15, %c0_16], %58 {strides = array<i32>} : memref<1x8x16x8xf32, #tpu.memory_space<vmem>>, vector<1x8x16x8xf32>,
    %cst_17 = arith.constant dense<0.000000e+00> : vector<8xf32>
    %60 = vector.multi_reduction <add>, %57, %cst_17 [0] : vector<128x8xf32> to vector<8xf32>
    %61 = vector.shape_cast %60 : vector<8xf32> to vector<1x8xf32>
    %62 = arith.mulf %57, %57 : vector<128x8xf32>
    %cst_18 = arith.constant dense<0.000000e+00> : vector<8xf32>
    %63 = vector.multi_reduction <add>, %62, %cst_18 [0] : vector<128x8xf32> to vector<8xf32>
    %64 = vector.shape_cast %63 : vector<8xf32> to vector<1x8xf32>
    %65 = tpu.concatenate %61, %64 in 0 : vector<1x8xf32>, vector<1x8xf32> -> vector<2x8xf32>
    %66 = vector.shape_cast %65 : vector<2x8xf32> to vector<1x1x2x8xf32>
    %c0_19 = arith.constant 0 : index
    %c0_20 = arith.constant 0 : index
    %c0_21 = arith.constant 0 : index
    %c0_22 = arith.constant 0 : index
    %67 = vector.load %arg5[%c0_19, %c0_20, %c0_21, %c0_22] : memref<1x1x2x8xf32, #tpu.memory_space<vmem>>, vector<1x1x2x8xf32>
    tpu.vector_store %arg5[%c0_19, %c0_20, %c0_21, %c0_22], %66 {strides = array<i32>} : memref<1x1x2x8xf32, #tpu.memory_space<vmem>>, vector<1x1x2x8xf32>,
    return
  }
  func.func @transform_0(%arg0: i32, %arg1: i32) -> (i32, i32, i32, i32) {
    %c0_i32 = arith.constant 0 : i32
    %c0_i32_0 = arith.constant 0 : i32
    %c0_i32_1 = arith.constant 0 : i32
    %c0_i32_2 = arith.constant 0 : i32
    return %arg0, %c0_i32, %c0_i32_0, %c0_i32_1 : i32, i32, i32, i32
  }
  func.func @transform_1(%arg0: i32, %arg1: i32) -> (i32, i32, i32) {
    %c0_i32 = arith.constant 0 : i32
    %c0_i32_0 = arith.constant 0 : i32
    %c0_i32_1 = arith.constant 0 : i32
    %c0_i32_2 = arith.constant 0 : i32
    return %c0_i32, %c0_i32_0, %c0_i32_1 : i32, i32, i32
  }
  func.func @transform_2(%arg0: i32, %arg1: i32) -> (i32, i32, i32, i32) {
    %c0_i32 = arith.constant 0 : i32
    %c0_i32_0 = arith.constant 0 : i32
    %c0_i32_1 = arith.constant 0 : i32
    return %arg0, %arg1, %c0_i32, %c0_i32_0 : i32, i32, i32, i32
  }
  func.func @transform_3(%arg0: i32, %arg1: i32) -> (i32, i32, i32, i32) {
    %c0_i32 = arith.constant 0 : i32
    %c0_i32_0 = arith.constant 0 : i32
    %c0_i32_1 = arith.constant 0 : i32
    return %arg0, %arg1, %c0_i32, %c0_i32_0 : i32, i32, i32, i32
  }
}

</mosaic_0001>

<bundles_post_ra>
// kernel: tpu_custom_call.1
= control target key start
LH: loop header
LB: loop body
LE: loop exit
PB: predicated region body
PF: predicated region fallthrough
CT: control target
= control target key end

     0   :  { %9 = vsyncpa [#allocation3], 0  ;;  %s3886_s0 = inlined_call_operand.vmem [shape: f32[2,18,18,4], index: 0, kind: input, shape index: {}]   ;;  %s3887_s1 = inlined_call_operand.vmem [shape: f32[9,4,8], index: 1, kind: input, shape index: {}]   ;;  %s3888_s2 = inlined_call_operand.vmem [shape: f32[2,16,16,8], index: 2, kind: output, shape index: {0}]   ;;  %s3889_s3 = inlined_call_operand.hbm [shape: f32[2,2,2,8], index: 3, kind: output, shape index: {1}]  }
   0x1   :  { %11 = vsyncpa [#allocation3 + $0x1], 0  ;;  %s3083_s12 = smov 0   ;;  %s3085_s13 = smov 0  }
   0x2   :  { %s3087_s14 = smov 0   ;;  %s3089_s15 = smov 0  }
   0x3   :  { %s3091_s16 = smov 0   ;;  %s3093_s17 = smov 0  }
   0x4   :  { %s3095_s18 = smov 0   ;;  %s3097_s19 = smov 0  }
   0x5 LB: > { %s2206_s20 = sadd.s32 4294967295, %s3060_s19   ;;  %s2207_s21 = sadd.s32 4294967294, %s3060_s19   ;;  %s3060_s19 = sphi %s3097_s19, %s17_s19   ;;  %s3056_s18 = sphi %s3095_s18, %s3898_s18   ;;  %s3052_s17 = sphi %s3093_s17, %s3897_s17   ;;  %s3048_s16 = sphi %s3091_s16, %s3896_s16   ;;  %s3044_s15 = sphi %s3089_s15, %s3895_s15   ;;  %s3040_s14 = sphi %s3087_s14, %s3894_s14   ;;  %s3036_s13 = sphi %s3085_s13, %s3893_s13   ;;  %s3032_s12 = sphi %s3083_s12, %s3892_s12  }
   0x6   : > { %s26_s22 = sadd.s32 1, %s3052_s17  ;;  %s29_s23 = sadd.s32 1, %s3056_s18 }
   0x7   : > { %p27_p0 = scmp.ge.s32.totalorder %s26_s22, 2  ;;  %p123_p1 = scmp.ne.s32.totalorder %s3040_s14, %s3036_s13 }
   0x8   : > { %p124_p2 = scmp.eq.s32.totalorder %s2206_s20, 3  ;;  %p129_p5 = scmp.ne.s32.totalorder %s3036_s13, %s3032_s12 }
   0x9   : > { %s3900_s22 = smov (%p27_p0, %s26_s22), 0  ;;  %s3902_s23 = smov (!%p27_p0, %s29_s23), %s3056_s18 }
   0xa   : > { %s109_s24 = ssub.s32 %s3052_s17, %s3900_s22  ;;  %p3134_p3 = por %p124_p2, %p123_p1 }
   0xb   : > { %p31_p4 = scmp.ge.s32.totalorder %s3902_s23, 2  ;;  %p130_p6 = scmp.eq.s32.totalorder %s2207_s21, 3 }
   0xc   : > { %p2210_p7 = scmp.ge.s32.totalorder %s3060_s19, 1  ;;  %p159_p9 = scmp.lt.s32.totalorder %s3060_s19, 5 }
   0xd   : > { %s3904_s23 = smov (%p31_p4, %s3902_s23), 0  ;;  %p3143_p8 = por %p130_p6, %p129_p5 }
   0xe   : > { %s108_s27 = ssub.s32 %s3056_s18, %s3904_s23  ;;  %s113_s28 = sadd.s32 1, %s3040_s14 }
   0xf   : > { %s110_s29 = sor.u32 %s109_s24, %s108_s27  ;;  %p160_p10 = pnand %p2210_p7, %p159_p9 }
  0x10   : > { %p111_p11 = scmp.eq.s32.totalorder %s110_s29, 0  ;;  %v243_v0 = vld [vmem:[%s3887_s1 + $0x4] sm:$0xf] (!%p160_p10)  ;;  %vm349_vm0 = vcmask (!%p160_p10), 1043456   ;;  %v3160_v1 = vld [vmem:[%s3887_s1 + $0x10] sm:$0xf] (!%p160_p10) }
  0x11   : > { %163 = sbr.rel (%p160_p10) target bundleno = 425 (0x1a9), region = 28  ;;  %p193_p12 = scmp.lt.s32.totalorder (!%p160_p10), %s3048_s16, 1  ;;  %2530 = vmatprep.subr.msk.mxu1 (!%p160_p10), %vm349_vm0, %v243_v0  ;;  %2634 = vmatprep.subr.msk.mxu0 (!%p160_p10), %vm349_vm0, %v3160_v1  ;;  %v242_v2 = vld [vmem:[%s3887_s1] sm:$0xf] (!%p160_p10)  ;;  %v247_v3 = vld [vmem:[%s3887_s1 + $0x14] sm:$0xf] (!%p160_p10) }
  0x12   : > { %s3152_s30 = scalar_select %p111_p11, %s3040_s14, %s113_s28  }
  0x13   : > { %2531 = vmatpush3.msk.msra.mxu1 (!%p160_p10), %vm349_vm0, %v243_v0  ;;  %2635 = vmatpush3.msk.msra.mxu0 (!%p160_p10), %vm349_vm0, %v3160_v1  ;;  %s2218_s21 = smul.u32 (!%p160_p10), 192, %s3044_s15  ;;  %vm275_vm1 = vcmask (!%p160_p10), 1046528   ;;  %vm316_vm2 = vcmask (!%p160_p10), 31744   ;;  %v3250_v33 = vld [vmem:[%s3887_s1 + $0x18] sm:$0xf] (!%p160_p10)  ;;  %vm678_vm3 = vcmask (!%p160_p10), 1045504  }
  0x14   : > { %2556 = vmatprep.subr.msk.mxu1 (!%p160_p10), %vm349_vm0, %v242_v2  ;;  %2660 = vmatprep.subr.msk.mxu0 (!%p160_p10), %vm349_vm0, %v247_v3  ;;  %v3260_v35 = vld [vmem:[%s3887_s1 + $0x8] sm:$0xf] (!%p160_p10)  ;;  %s2213_s28 = sshll.u32 (!%p160_p10), %s3044_s15, 3  ;;  %vm1949_vm4 = vcmask (!%p160_p10), 64512   ;;  %s2373_s20 = sshll.u32 (!%p160_p10), %s3048_s16, 1  ;;  %vm2056_vm5 = vcmask (!%p160_p10), 1040384  }
  0x15   : > { %p201_p13 = scmp.lt.s32.totalorder (!%p160_p10), %s2213_s28, 15  ;;  %vm2058_vm6 = vcmask (!%p160_p10), 58368  }
  0x18   : > { %s3173_s10 = scalar_select %p193_p12, %s3048_s16, 1 }
  0x19   : > { %s3906_s28 = smov (!%p201_p13, %s2213_s28), 15 }
  0x1a   : > { %s2894_s24 = smul.u32 432, %s3173_s10 }
  0x1c   : > { %s197_s29 = scalar_lea.vmem %s3886_s0, %s2894_s24 }
  0x1d   : > { %s3185_s4 = scalar_lea.vmem %s197_s29, %s2218_s21  ;;  %s2214_s29 = sshll.u32 %s3906_s28, 1 }
  0x1e   : > { %v3188_v4 = vld [vmem:[%s3185_s4] sm:$0xff]  ;;  %v3191_v5 = vld [vmem:[%s3185_s4 + $0x8] sm:$0xff]  ;;  %v3194_v6 = vld [vmem:[%s3185_s4 + $0x18] sm:$0xff]  ;;  %s2086_s21 = sadd.s32 %s3044_s15, %s2373_s20 }
  0x1f   : > { %v276_v7 = vrot.slane %v3188_v4, 1  ;;  %v277_v8 = vrot.slane %v3191_v5, 1  ;;  %v3199_v9 = vld [vmem:[%s3185_s4 + $0x20] sm:$0xff]  ;;  %v281_v10 = vrot.slane %v3194_v6, 1  ;;  %v3203_v11 = vld [vmem:[%s3185_s4 + $0x10] sm:$0x3] }
  0x20   : > { %v282_v12 = vrot.slane %v3199_v9, 1  ;;  %v279_v13 = vrot.slane %v3203_v11, 1  ;;  %v3208_v14 = vld [vmem:[%s3185_s4 + $0x28] sm:$0x3]  ;;  %v3211_v15 = vld [vmem:[%s3185_s4 + $0x30] sm:$0xff]  ;;  %v3216_v18 = vld [vmem:[%s3185_s4 + $0x38] sm:$0xff] }
  0x21   : > { %v278_v16 = vsel %vm275_vm1, %v276_v7, %v277_v8  ;;  %v284_v17 = vrot.slane %v3208_v14, 1  ;;  %v286_v19 = vrot.slane %v3211_v15, 1  ;;  %v3220_v20 = vld [vmem:[%s3185_s4 + $0x40] sm:$0x3]  ;;  %v287_v23 = vrot.slane %v3216_v18, 1  ;;  %v3228_v25 = vld [vmem:[%s3185_s4 + $0x48] sm:$0xff] }
  0x22   : > { %2532 = vmatprep.mubr.msk.f32.mxu1 %vm316_vm2, %v278_v16  ;;  %v283_v21 = vsel %vm275_vm1, %v281_v10, %v282_v12  ;;  %v280_v22 = vsel %vm275_vm1, %v277_v8, %v279_v13  ;;  %v289_v24 = vrot.slane %v3220_v20, 1  ;;  %v3231_v26 = vld [vmem:[%s3185_s4 + $0x50] sm:$0xff]  ;;  %v3234_v27 = vld [vmem:[%s3185_s4 + $0x58] sm:$0x3]  ;;  %v291_v29 = vrot.slane %v3228_v25, 1  ;;  %v3242_v31 = vld [vmem:[%s3185_s4 + $0x60] sm:$0xff] }
  0x23   : > { %2636 = vmatprep.mubr.msk.f32.mxu0 %vm316_vm2, %v283_v21  ;;  %2533 = vmatmul.mubr.msk.f32.vlgmr.msra.gmra.mrb[0].mxu1 %vm316_vm2, %v280_v22  ;;  %v285_v28 = vsel %vm275_vm1, %v282_v12, %v284_v17  ;;  %v292_v30 = vrot.slane %v3231_v26, 1  ;;  %v3245_v32 = vld [vmem:[%s3185_s4 + $0x68] sm:$0xff]  ;;  %v3255_v34 = vsel %vm275_vm1, %v286_v19, %v287_v23  ;;  %v294_v37 = vrot.slane %v3234_v27, 1  ;;  %v3276_v41 = vld [vmem:[%s3185_s4 + $0x70] sm:$0x3]  ;;  %v3299_v47 = vld [vmem:[%s3185_s4 + $0x78] sm:$0xff] }
  0x24   : > { %2557 = vmatpush3.msk.msra.mxu1 %vm349_vm0, %v242_v2  ;;  %2637 = vmatmul.mubr.msk.f32.vlgmr.msra.gmra.mrb[0].mxu0 %vm316_vm2, %v285_v28  ;;  %v3265_v36 = vsel %vm275_vm1, %v287_v23, %v289_v24  ;;  %v296_v39 = vrot.slane %v3242_v31, 1  ;;  %v297_v40 = vrot.slane %v3245_v32, 1  ;;  %v299_v43 = vrot.slane %v3276_v41, 1  ;;  %v3302_v48 = vld [vmem:[%s3185_s4 + $0x80] sm:$0xff]  ;;  %v3311_v49 = vld [vmem:[%s3185_s4 + $0x88] sm:$0x3] }
  0x25   : > { %2661 = vmatpush3.msk.msra.mxu0 %vm349_vm0, %v247_v3  ;;  %2535 = vmatprep.mubr.msk.f32.mxu1 %vm316_vm2, %v283_v21  ;;  %v3271_v38 = vsel %vm275_vm1, %v291_v29, %v292_v30  ;;  %v3290_v42 = vsel %vm275_vm1, %v292_v30, %v294_v37  ;;  %v684_v45 = vrot.slane %v3194_v6, 2  ;;  %v685_v46 = vrot.slane %v3199_v9, 2  ;;  %v3322_v54 = vld [vmem:[%s3185_s4 + $0x90] sm:$0xff]  ;;  %v3325_v55 = vld [vmem:[%s3185_s4 + $0x98] sm:$0xff]  ;;  %v3343_v63 = vld [vmem:[%s3185_s4 + $0xa0] sm:$0x3] }
  0x26   : > { %2639 = vmatprep.mubr.msk.f32.mxu0 %vm316_vm2, %v3255_v34  ;;  %2686 = vmatprep.subr.msk.mxu0 %vm349_vm0, %v3250_v33  ;;  %v3294_v44 = vsel %vm275_vm1, %v296_v39, %v297_v40  ;;  %v687_v50 = vrot.slane %v3208_v14, 2  ;;  %v3317_v51 = vsel %vm275_vm1, %v297_v40, %v299_v43  ;;  %v301_v52 = vrot.slane %v3299_v47, 1  ;;  %v3358_v8 = vld [vmem:[%s3887_s1 + $0x1c] sm:$0xf]  ;;  %v3364_v12 = vld [vmem:[%s3185_s4 + $0xa8] sm:$0xff]  ;;  %v3367_v13 = vld [vmem:[%s3185_s4 + $0xb0] sm:$0xff] }
  0x27   : > { %2536 = vmatmul.mubr.msk.f32.gmra.mrb[2].mxu1 %vm316_vm2, %v285_v28  ;;  %2582 = vmatprep.subr.msk.mxu1 %vm349_vm0, %v3260_v35  ;;  %v302_v53 = vrot.slane %v3302_v48, 1  ;;  %v3328_v56 = vsel %vm678_vm3, %v684_v45, %v685_v46  ;;  %v689_v57 = vrot.slane %v3211_v15, 2  ;;  %v690_v58 = vrot.slane %v3216_v18, 2  ;;  %v3370_v14 = vld [vmem:[%s3185_s4 + $0xd8] sm:$0xff]  ;;  %v3383_v21 = vld [vmem:[%s3185_s4 + $0xe0] sm:$0xff]  ;;  %s2374_s24 = sshll.u32 %s2086_s21, 5 }
  0x28   : > { %2640 = vmatmul.mubr.msk.f32.gmra.mrb[2].mxu0 %vm316_vm2, %v3265_v36  ;;  %2538 = vmatprep.mubr.msk.f32.mxu1 %vm316_vm2, %v3255_v34  ;;  %v304_v59 = vrot.slane %v3311_v49, 1  ;;  %v692_v60 = vrot.slane %v3220_v20, 2  ;;  %v306_v61 = vrot.slane %v3322_v54, 1  ;;  %v307_v62 = vrot.slane %v3325_v55, 1  ;;  %v241_v22 = vld [vmem:[%s3185_s4 + $0xe8] sm:$0x3] }
  0x29   : > { %2642 = vmatprep.mubr.msk.f32.mxu0 %vm316_vm2, %v3271_v38  ;;  %v3348_v0 = vsel %vm678_vm3, %v685_v46, %v687_v50  ;;  %v3351_v2 = vsel %vm275_vm1, %v301_v52, %v302_v53  ;;  %v694_v3 = vrot.slane %v3228_v25, 2  ;;  %v695_v7 = vrot.slane %v3231_v26, 2  ;;  %v3406_v40 = vld [vmem:[%s3185_s4 + $0xb8] sm:$0x3] }
  0x2a   : > { %v3361_v10 = vsel %vm678_vm3, %v689_v57, %v690_v58  ;;  %v3375_v16 = vsel %vm275_vm1, %v302_v53, %v304_v59  ;;  %v3378_v17 = vsel %vm678_vm3, %v690_v58, %v692_v60  ;;  %v309_v19 = vrot.slane %v3343_v63, 1 }
  0x2b   : > { %2539 = vmatmul.mubr.msk.f32.gmra.mrb[4].mxu1 %vm316_vm2, %v3265_v36  ;;  %v1603_v20 = vrot.slane %v3370_v14, 1  ;;  %v3391_v23 = vsel %vm275_vm1, %v306_v61, %v307_v62  ;;  %v697_v24 = vrot.slane %v3234_v27, 2  ;;  %v1776_v28 = vrot.slane %v3370_v14, 2 }
  0x2c   : > { %2643 = vmatmul.mubr.msk.f32.gmra.mrb[4].mxu0 %vm316_vm2, %v3290_v42  ;;  %2541 = vmatprep.mubr.msk.f32.mxu1 %vm316_vm2, %v3271_v38  ;;  %v1604_v29 = vrot.slane %v3383_v21, 1  ;;  %v3401_v30 = vsel %vm678_vm3, %v694_v3, %v695_v7  ;;  %v311_v37 = vrot.slane %v3364_v12, 1  ;;  %v312_v39 = vrot.slane %v3367_v13, 1 }
  0x2d   : > { %2645 = vmatprep.mubr.msk.f32.mxu0 %vm316_vm2, %v3294_v44  ;;  %v1777_v27 = vrot.slane %v3383_v21, 2  ;;  %v699_v43 = vrot.slane %v3242_v31, 2  ;;  %v700_v45 = vrot.slane %v3245_v32, 2  ;;  %v1606_v46 = vrot.slane %v241_v22, 1 }
  0x2e   : > { %v1779_v52 = vrot.slane %v241_v22, 2  ;;  %v3426_v53 = vsel %vm275_vm1, %v307_v62, %v309_v19  ;;  %v314_v57 = vrot.slane %v3406_v40, 1  ;;  %v3435_v59 = vsel %vm678_vm3, %v695_v7, %v697_v24 }
  0x2f   : > { %2542 = vmatmul.mubr.msk.f32.gmra.mrb[6].mxu1 %vm316_vm2, %v3290_v42  ;;  %v3419_v50 = vsel %vm678_vm3, %v1776_v28, %v1777_v27  ;;  %v3430_v58 = vsel %vm275_vm1, %v1604_v29, %v1606_v46  ;;  %v3438_v60 = vsel %vm275_vm1, %v311_v37, %v312_v39  ;;  %v702_v61 = vrot.slane %v3276_v41, 2  ;;  %v3492_v46 = vld [vmem:[%s3185_s4 + $0xc8] sm:$0xff] }
  0x30   : > { %2646 = vmatmul.mubr.msk.f32.gmra.mrb[6].mxu0 %vm316_vm2, %v3317_v51  ;;  %2544 = vmatprep.mubr.msk.f32.mxu1 %vm316_vm2, %v3294_v44  ;;  %v3442_v3 = vsel %vm678_vm3, %v1777_v27, %v1779_v52  ;;  %v3445_v62 = vsel %vm678_vm3, %v699_v43, %v700_v45  ;;  %v704_v19 = vrot.slane %v3299_v47, 2  ;;  %v3456_v41 = vsel %vm275_vm1, %v312_v39, %v314_v57  ;;  %v245_v52 = vld [vmem:[%s3887_s1 + $0xc] sm:$0xf] }
  0x31   : > { %2662 = vmatprep.mubr.msk.f32.mxu0 %vm316_vm2, %v3328_v56  ;;  %v3461_v7 = vsel %vm678_vm3, %v700_v45, %v702_v61  ;;  %v707_v22 = vrot.slane %v3311_v49, 2  ;;  %v709_v28 = vrot.slane %v3322_v54, 2  ;;  %v712_v37 = vrot.slane %v3343_v63, 2  ;;  %v3489_v45 = vld [vmem:[%s3185_s4 + $0xc0] sm:$0xff] }
  0x32   : > { %v714_v27 = vrot.slane %v3364_v12, 2  ;;  %v715_v43 = vrot.slane %v3367_v13, 2  ;;  %v717_v57 = vrot.slane %v3406_v40, 2 }
  0x33   : > { %2545 = vmatmul.mubr.msk.f32.gmra.mrb[8].mxu1 %vm316_vm2, %v3317_v51 }
  0x34   : > { %2663 = vmatmul.mubr.msk.f32.vlgmr.msra.gmra.mrb[0].mxu0 %vm316_vm2, %v3348_v0  ;;  %2547 = vmatprep.mubr.msk.f32.mxu1 %vm316_vm2, %v3351_v2  ;;  %v3510_v61 = vsel %vm678_vm3, %v714_v27, %v715_v43  ;;  %v3527_v40 = vsel %vm678_vm3, %v715_v43, %v717_v57  ;;  %v679_v27 = vrot.slane %v3188_v4, 2  ;;  %v682_v43 = vrot.slane %v3203_v11, 2 }
  0x35   : > { %2687 = vmatpush3.msk.msra.mxu0 %vm349_vm0, %v3250_v33  ;;  %2665 = vmatprep.mubr.msk.f32.mxu0 %vm316_vm2, %v3361_v10  ;;  %v3414_v33 = vsel %vm275_vm1, %v1603_v20, %v1604_v29  ;;  %v705_v20 = vrot.slane %v3302_v48, 2  ;;  %v710_v29 = vrot.slane %v3325_v55, 2  ;;  %v1087_v11 = vrot.slane %v3492_v46, 1 }
  0x36   : > { %2712 = vmatprep.subr.msk.mxu0 %vm349_vm0, %v3358_v8 }
  0x37   : > { %2548 = vmatmul.mubr.msk.f32.gmra.mrb[10].mxu1 %vm316_vm2, %v3375_v16  ;;  %v3465_v24 = vsel %vm678_vm3, %v704_v19, %v705_v20  ;;  %v3478_v49 = vsel %vm678_vm3, %v705_v20, %v707_v22  ;;  %v3482_v39 = vsel %vm678_vm3, %v709_v28, %v710_v29  ;;  %v3506_v63 = vsel %vm678_vm3, %v710_v29, %v712_v37  ;;  %v3515_v20 = vld [vmem:[%s3185_s4 + $0xd0] sm:$0x3]  ;;  %v250_v37 = vld [vmem:[%s3887_s1 + $0x20] sm:$0xf]  ;;  %s2215_s4 = sshll.u32 %s3173_s10, 5  ;;  %s190_s10 = sand.u32 1, %s3036_s13  }
  0x38   : > { %2666 = vmatmul.mubr.msk.f32.gmra.mrb[2].mxu0 %vm316_vm2, %v3378_v17  ;;  %2550 = vmatprep.mubr.msk.f32.mxu1 %vm316_vm2, %v3391_v23  ;;  %v1259_v19 = vrot.slane %v3489_v45, 2  ;;  %v1262_v22 = vrot.slane %v3515_v20, 2  ;;  %s205_s5 = sadd.s32 %s2215_s4, %s2214_s29  ;;  %s2211_s11 = sshll.u32 %s190_s10, 1 }
  0x39   : > { %2668 = vmatprep.mubr.msk.f32.mxu0 %vm316_vm2, %v3401_v30  ;;  %s2216_s6 = sshll.u32 %s205_s5, 3  ;;  %s192_s27 = scalar_lea.vmem [#allocation2], %s2211_s11 }
  0x3a   : > { %s3761_s9 = scalar_lea.vmem %s3888_s2, %s2216_s6  ;;  %s2090_s28 = sshll.u32 %s192_s27, 4  ;;  %s3835_s28 = int_to_ptr.vmem [resolvable:$true] %s2090_s28 }
  0x3b   : > { %2551 = vmatmul.mubr.msk.f32.gmra.mrb[12].mxu1 %vm316_vm2, %v3426_v53  ;;  %s3833_s5 = scalar_lea.hbm %s3889_s3, %s2374_s24  ;;  %s2071_s15 = scalar_lea.sflag [#allocation3], %s190_s10 }
  0x3c   : > { %2669 = vmatmul.mubr.msk.f32.gmra.mrb[4].mxu0 %vm316_vm2, %v3435_v59  ;;  %2553 = vmatprep.mubr.msk.f32.mxu1 %vm316_vm2, %v3438_v60  ;;  %s2966_s16 = scalar_lea.vmem %s3835_s28, 32  ;;  %s3062_s6 = smov [#allocation2]  }
  0x3d   : > { %2671 = vmatprep.mubr.msk.f32.mxu0 %vm316_vm2, %v3445_v62  ;;  %p2967_p0 = scmp.ne.s32.totalorder %s3835_s28, %s2966_s16  ;;  %s2970_s7 = sshll.u32 %s3062_s6, 4  ;;  %s2971_s7 = int_to_ptr.vmem [resolvable:$false] %s2970_s7 }
  0x3e   : > { %s2972_s8 = scalar_lea.vmem %s2971_s7, 64  ;;  %p2973_p4 = scmp.lt.s32.totalorder %s3835_s28, %s2971_s7 }
  0x3f   : > { %2554 = vmatmul.mubr.msk.f32.gmra.mrb[14].mxu1 %vm316_vm2, %v3456_v41  ;;  %p2968_p1 = pnand %p2967_p0, %p3134_p3  ;;  %p2974_p5 = scmp.lt.s32.totalorder %s2972_s8, %s2966_s16 }
  0x40   : > { %2672 = vmatmul.mubr.msk.f32.gmra.mrb[6].mxu0 %vm316_vm2, %v3461_v7  ;;  %2558 = vmatprep.mubr.msk.f32.mxu1 %vm316_vm2, %v3188_v4 }
  0x41   : > { %2674 = vmatprep.mubr.msk.f32.mxu0 %vm316_vm2, %v3465_v24  ;;  %p2969_p2 = pneg %p2968_p1  ;;  %p2975_p6 = por %p2974_p5, %p2973_p4 }
  0x43   : > { %2559 = vmatmul.mubr.msk.f32.vlgmr.msra.gmra.mrb[0].mxu1 %vm316_vm2, %v3191_v5  ;;  %p2976_p7 = pnand %p2975_p6, %p2969_p2 }
  0x44   : > { %2583 = vmatpush3.msk.msra.mxu1 %vm349_vm0, %v3260_v35  ;;  %2675 = vmatmul.mubr.msk.f32.gmra.mrb[8].mxu0 %vm316_vm2, %v3478_v49  ;;  %v1260_v35 = vrot.slane %v3492_v46, 2 }
  0x45   : > { %2561 = vmatprep.mubr.msk.f32.mxu1 %vm316_vm2, %v3194_v6  ;;  %2677 = vmatprep.mubr.msk.f32.mxu0 %vm316_vm2, %v3482_v39 }
  0x46   : > { %2608 = vmatprep.subr.msk.mxu1 %vm349_vm0, %v245_v52  ;;  %v3531_v28 = vsel %vm678_vm3, %v1259_v19, %v1260_v35  ;;  %v3542_v29 = vsel %vm678_vm3, %v1260_v35, %v1262_v22 }
  0x47   : > { %2562 = vmatmul.mubr.msk.f32.gmra.mrb[2].mxu1 %vm316_vm2, %v3199_v9 }
  0x48   : > { %2678 = vmatmul.mubr.msk.f32.gmra.mrb[10].mxu0 %vm316_vm2, %v3506_v63  ;;  %2564 = vmatprep.mubr.msk.f32.mxu1 %vm316_vm2, %v3211_v15 }
  0x49   : > { %2680 = vmatprep.mubr.msk.f32.mxu0 %vm316_vm2, %v3510_v61 }
  0x4b   : > { %2565 = vmatmul.mubr.msk.f32.gmra.mrb[4].mxu1 %vm316_vm2, %v3216_v18 }
  0x4c   : > { %2681 = vmatmul.mubr.msk.f32.gmra.mrb[12].mxu0 %vm316_vm2, %v3527_v40  ;;  %2567 = vmatprep.mubr.msk.f32.mxu1 %vm316_vm2, %v3228_v25 }
  0x4d   : > { %2683 = vmatprep.mubr.msk.f32.mxu0 %vm316_vm2, %v3531_v28 }
  0x4f   : > { %2568 = vmatmul.mubr.msk.f32.gmra.mrb[6].mxu1 %vm316_vm2, %v3231_v26 }
  0x50   : > { %2684 = vmatmul.mubr.msk.f32.gmra.mrb[14].mxu0 %vm316_vm2, %v3542_v29  ;;  %2570 = vmatprep.mubr.msk.f32.mxu1 %vm316_vm2, %v3242_v31 }
  0x51   : > { %2688 = vmatprep.mubr.msk.f32.mxu0 %vm316_vm2, %v3211_v15 }
  0x53   : > { %2571 = vmatmul.mubr.msk.f32.gmra.mrb[8].mxu1 %vm316_vm2, %v3245_v32 }
  0x54   : > { %2689 = vmatmul.mubr.msk.f32.vlgmr.msra.gmra.mrb[0].mxu0 %vm316_vm2, %v3216_v18  ;;  %2573 = vmatprep.mubr.msk.f32.mxu1 %vm316_vm2, %v3299_v47 }
  0x55   : > { %2713 = vmatpush3.msk.msra.mxu0 %vm349_vm0, %v3358_v8  ;;  %2691 = vmatprep.mubr.msk.f32.mxu0 %vm316_vm2, %v3228_v25  ;;  %v680_v8 = vrot.slane %v3191_v5, 2  ;;  %v1086_v5 = vrot.slane %v3489_v45, 1 }
  0x56   : > { %2738 = vmatprep.subr.msk.mxu0 %vm349_vm0, %v250_v37 }
  0x57   : > { %2574 = vmatmul.mubr.msk.f32.gmra.mrb[10].mxu1 %vm316_vm2, %v3302_v48  ;;  %v681_v57 = vsel %vm678_vm3, %v679_v27, %v680_v8  ;;  %v683_v4 = vsel %vm678_vm3, %v680_v8, %v682_v43 }
  0x58   : > { %2692 = vmatmul.mubr.msk.f32.gmra.mrb[2].mxu0 %vm316_vm2, %v3231_v26  ;;  %2576 = vmatprep.mubr.msk.f32.mxu1 %vm316_vm2, %v3322_v54 }
  0x59   : > { %2694 = vmatprep.mubr.msk.f32.mxu0 %vm316_vm2, %v3242_v31 }
  0x5b   : > { %2577 = vmatmul.mubr.msk.f32.gmra.mrb[12].mxu1 %vm316_vm2, %v3325_v55 }
  0x5c   : > { %2695 = vmatmul.mubr.msk.f32.gmra.mrb[4].mxu0 %vm316_vm2, %v3245_v32  ;;  %2579 = vmatprep.mubr.msk.f32.mxu1 %vm316_vm2, %v3364_v12 }
  0x5d   : > { %2697 = vmatprep.mubr.msk.f32.mxu0 %vm316_vm2, %v3299_v47 }
  0x5f   : > { %2580 = vmatmul.mubr.msk.f32.gmra.mrb[14].mxu1 %vm316_vm2, %v3367_v13 }
  0x60   : > { %2698 = vmatmul.mubr.msk.f32.gmra.mrb[6].mxu0 %vm316_vm2, %v3302_v48  ;;  %2584 = vmatprep.mubr.msk.f32.mxu1 %vm316_vm2, %v681_v57 }
  0x61   : > { %2700 = vmatprep.mubr.msk.f32.mxu0 %vm316_vm2, %v3322_v54 }
  0x63   : > { %2585 = vmatmul.mubr.msk.f32.vlgmr.msra.gmra.mrb[0].mxu1 %vm316_vm2, %v683_v4 }
  0x64   : > { %2609 = vmatpush3.msk.msra.mxu1 %vm349_vm0, %v245_v52  ;;  %2701 = vmatmul.mubr.msk.f32.gmra.mrb[8].mxu0 %vm316_vm2, %v3325_v55 }
  0x65   : > { %2587 = vmatprep.mubr.msk.f32.mxu1 %vm316_vm2, %v3328_v56  ;;  %2703 = vmatprep.mubr.msk.f32.mxu0 %vm316_vm2, %v3364_v12 }
  0x66   : > { %2764 = vmatprep.subr.msk.mxu1 %vm349_vm0, %v3160_v1 }
  0x67   : > { %2588 = vmatmul.mubr.msk.f32.gmra.mrb[2].mxu1 %vm316_vm2, %v3348_v0 }
  0x68   : > { %2704 = vmatmul.mubr.msk.f32.gmra.mrb[10].mxu0 %vm316_vm2, %v3367_v13  ;;  %2590 = vmatprep.mubr.msk.f32.mxu1 %vm316_vm2, %v3361_v10 }
  0x69   : > { %2706 = vmatprep.mubr.msk.f32.mxu0 %vm316_vm2, %v3489_v45 }
  0x6b   : > { %2591 = vmatmul.mubr.msk.f32.gmra.mrb[4].mxu1 %vm316_vm2, %v3378_v17 }
  0x6c   : > { %2707 = vmatmul.mubr.msk.f32.gmra.mrb[12].mxu0 %vm316_vm2, %v3492_v46  ;;  %2593 = vmatprep.mubr.msk.f32.mxu1 %vm316_vm2, %v3401_v30 }
  0x6d   : > { %2709 = vmatprep.mubr.msk.f32.mxu0 %vm316_vm2, %v3370_v14 }
  0x6f   : > { %2594 = vmatmul.mubr.msk.f32.gmra.mrb[6].mxu1 %vm316_vm2, %v3435_v59 }
  0x70   : > { %2710 = vmatmul.mubr.msk.f32.gmra.mrb[14].mxu0 %vm316_vm2, %v3383_v21  ;;  %2596 = vmatprep.mubr.msk.f32.mxu1 %vm316_vm2, %v3445_v62 }
  0x71   : > { %2714 = vmatprep.mubr.msk.f32.mxu0 %vm316_vm2, %v3255_v34  ;;  %v1088_v34 = vsel %vm275_vm1, %v1086_v5, %v1087_v11 }
  0x73   : > { %2597 = vmatmul.mubr.msk.f32.gmra.mrb[8].mxu1 %vm316_vm2, %v3461_v7 }
  0x74   : > { %2715 = vmatmul.mubr.msk.f32.vlgmr.msra.gmra.mrb[0].mxu0 %vm316_vm2, %v3265_v36  ;;  %2599 = vmatprep.mubr.msk.f32.mxu1 %vm316_vm2, %v3465_v24 }
  0x75   : > { %2739 = vmatpush3.msk.msra.mxu0 %vm349_vm0, %v250_v37  ;;  %2717 = vmatprep.mubr.msk.f32.mxu0 %vm316_vm2, %v3271_v38 }
  0x77   : > { %2600 = vmatmul.mubr.msk.f32.gmra.mrb[10].mxu1 %vm316_vm2, %v3478_v49 }
  0x78   : > { %2718 = vmatmul.mubr.msk.f32.gmra.mrb[2].mxu0 %vm316_vm2, %v3290_v42  ;;  %2602 = vmatprep.mubr.msk.f32.mxu1 %vm316_vm2, %v3482_v39 }
  0x79   : > { %2720 = vmatprep.mubr.msk.f32.mxu0 %vm316_vm2, %v3294_v44 }
  0x7b   : > { %2603 = vmatmul.mubr.msk.f32.gmra.mrb[12].mxu1 %vm316_vm2, %v3506_v63 }
  0x7c   : > { %2721 = vmatmul.mubr.msk.f32.gmra.mrb[4].mxu0 %vm316_vm2, %v3317_v51  ;;  %2605 = vmatprep.mubr.msk.f32.mxu1 %vm316_vm2, %v3510_v61 }
  0x7d   : > { %2723 = vmatprep.mubr.msk.f32.mxu0 %vm316_vm2, %v3351_v2 }
  0x7f   : > { %2606 = vmatmul.mubr.msk.f32.gmra.mrb[14].mxu1 %vm316_vm2, %v3527_v40 }
  0x80   : > { %2724 = vmatmul.mubr.msk.f32.gmra.mrb[6].mxu0 %vm316_vm2, %v3375_v16  ;;  %2610 = vmatprep.mubr.msk.f32.mxu1 %vm316_vm2, %v3194_v6  ;;  %v1089_v6 = vrot.slane %v3515_v20, 1 }
  0x81   : > { %2726 = vmatprep.mubr.msk.f32.mxu0 %vm316_vm2, %v3391_v23 }
  0x83   : > { %2611 = vmatmul.mubr.msk.f32.vlgmr.msra.gmra.mrb[0].mxu1 %vm316_vm2, %v3199_v9 }
  0x84   : > { %2765 = vmatpush3.msk.msra.mxu1 %vm349_vm0, %v3160_v1  ;;  %2727 = vmatmul.mubr.msk.f32.gmra.mrb[8].mxu0 %vm316_vm2, %v3426_v53  ;;  %v1090_v1 = vsel %vm275_vm1, %v1087_v11, %v1089_v6 }
  0x85   : > { %2613 = vmatprep.mubr.msk.f32.mxu1 %vm316_vm2, %v3211_v15  ;;  %2729 = vmatprep.mubr.msk.f32.mxu0 %vm316_vm2, %v3438_v60 }
  0x87   : > { %2614 = vmatmul.mubr.msk.f32.gmra.mrb[2].mxu1 %vm316_vm2, %v3216_v18 }
  0x88   : > { %2730 = vmatmul.mubr.msk.f32.gmra.mrb[10].mxu0 %vm316_vm2, %v3456_v41  ;;  %2616 = vmatprep.mubr.msk.f32.mxu1 %vm316_vm2, %v3228_v25 }
  0x89   : > { %2732 = vmatprep.mubr.msk.f32.mxu0 %vm316_vm2, %v1088_v34 }
  0x8b   : > { %2617 = vmatmul.mubr.msk.f32.gmra.mrb[4].mxu1 %vm316_vm2, %v3231_v26 }
  0x8c   : > { %2733 = vmatmul.mubr.msk.f32.gmra.mrb[12].mxu0 %vm316_vm2, %v1090_v1  ;;  %2619 = vmatprep.mubr.msk.f32.mxu1 %vm316_vm2, %v3242_v31 }
  0x8d   : > { %2735 = vmatprep.mubr.msk.f32.mxu0 %vm316_vm2, %v3414_v33 }
  0x8f   : > { %2620 = vmatmul.mubr.msk.f32.gmra.mrb[6].mxu1 %vm316_vm2, %v3245_v32 }
  0x90   : > { %2736 = vmatmul.mubr.msk.f32.gmra.mrb[14].mxu0 %vm316_vm2, %v3430_v58  ;;  %2622 = vmatprep.mubr.msk.f32.mxu1 %vm316_vm2, %v3299_v47 }
  0x91   : > { %2740 = vmatprep.mubr.msk.f32.mxu0 %vm316_vm2, %v3361_v10 }
  0x93   : > { %2623 = vmatmul.mubr.msk.f32.gmra.mrb[8].mxu1 %vm316_vm2, %v3302_v48 }
  0x94   : > { %2741 = vmatmul.mubr.msk.f32.vlgmr.msra.gmra.mrb[0].mxu0 %vm316_vm2, %v3378_v17  ;;  %2625 = vmatprep.mubr.msk.f32.mxu1 %vm316_vm2, %v3322_v54 }
  0x95   : > { %2743 = vmatprep.mubr.msk.f32.mxu0 %vm316_vm2, %v3401_v30 }
  0x97   : > { %2626 = vmatmul.mubr.msk.f32.gmra.mrb[10].mxu1 %vm316_vm2, %v3325_v55 }
  0x98   : > { %2744 = vmatmul.mubr.msk.f32.gmra.mrb[2].mxu0 %vm316_vm2, %v3435_v59  ;;  %2628 = vmatprep.mubr.msk.f32.mxu1 %vm316_vm2, %v3364_v12 }
  0x99   : > { %2746 = vmatprep.mubr.msk.f32.mxu0 %vm316_vm2, %v3445_v62 }
  0x9b   : > { %2629 = vmatmul.mubr.msk.f32.gmra.mrb[12].mxu1 %vm316_vm2, %v3367_v13 }
  0x9c   : > { %2747 = vmatmul.mubr.msk.f32.gmra.mrb[4].mxu0 %vm316_vm2, %v3461_v7  ;;  %2631 = vmatprep.mubr.msk.f32.mxu1 %vm316_vm2, %v3489_v45 }
  0x9d   : > { %2749 = vmatprep.mubr.msk.f32.mxu0 %vm316_vm2, %v3465_v24 }
  0x9f   : > { %2632 = vmatmul.mubr.msk.f32.gmra.mrb[14].mxu1 %vm316_vm2, %v3492_v46 }
  0xa0   : > { %2750 = vmatmul.mubr.msk.f32.gmra.mrb[6].mxu0 %vm316_vm2, %v3478_v49  ;;  %2648 = vmatprep.mubr.msk.f32.mxu1 %vm316_vm2, %v3351_v2 }
  0xa1   : > { %2752 = vmatprep.mubr.msk.f32.mxu0 %vm316_vm2, %v3482_v39 }
  0xa3   : > { %2649 = vmatmul.mubr.msk.f32.vlgmr.msra.gmra.mrb[8].mxu1 %vm316_vm2, %v3375_v16 }
  0xa4   : > { %2753 = vmatmul.mubr.msk.f32.gmra.mrb[8].mxu0 %vm316_vm2, %v3506_v63  ;;  %2651 = vmatprep.mubr.msk.f32.mxu1 %vm316_vm2, %v3391_v23 }
  0xa5   : > { %2755 = vmatprep.mubr.msk.f32.mxu0 %vm316_vm2, %v3510_v61 }
  0xa7   : > { %2652 = vmatmul.mubr.msk.f32.gmra.mrb[10].mxu1 %vm316_vm2, %v3426_v53 }
  0xa8   : > { %2756 = vmatmul.mubr.msk.f32.gmra.mrb[10].mxu0 %vm316_vm2, %v3527_v40  ;;  %2654 = vmatprep.mubr.msk.f32.mxu1 %vm316_vm2, %v3438_v60 }
  0xa9   : > { %2758 = vmatprep.mubr.msk.f32.mxu0 %vm316_vm2, %v3531_v28 }
  0xab   : > { %2655 = vmatmul.mubr.msk.f32.gmra.mrb[12].mxu1 %vm316_vm2, %v3456_v41 }
  0xac   : > { %2759 = vmatmul.mubr.msk.f32.gmra.mrb[12].mxu0 %vm316_vm2, %v3542_v29  ;;  %2657 = vmatprep.mubr.msk.f32.mxu1 %vm316_vm2, %v1088_v34 }
  0xad   : > { %2761 = vmatprep.mubr.msk.f32.mxu0 %vm316_vm2, %v3419_v50 }
  0xaf   : > { %2658 = vmatmul.mubr.msk.f32.gmra.mrb[14].mxu1 %vm316_vm2, %v1090_v1 }
  0xb0   : > { %2762 = vmatmul.mubr.msk.f32.gmra.mrb[14].mxu0 %vm316_vm2, %v3442_v3 }
 0x156   : > { %v2612_v9 = vpop.f32.mrb[0].mxu1 }
 0x157   : > { %v990_v15 = vpop.f32.mrb[1].mxu1 }
 0x15a   : > { %v2615_v18 = vpop.f32.mrb[2].mxu1 }
 0x15b   : > { %v1000_v25 = vpop.f32.mrb[3].mxu1 }
 0x15e   : > { %v2618_v26 = vpop.f32.mrb[4].mxu1 }
 0x15f   : > { %v1010_v31 = vpop.f32.mrb[5].mxu1 }
 0x162   : > { %v2621_v32 = vpop.f32.mrb[6].mxu1 }
 0x163   : > { %v1020_v36 = vpop.f32.mrb[7].mxu1 }
 0x167   : > { %v2742_v38 = vpop.f32.mrb[0].mxu0 }
 0x168   : > { %v2766_v42 = vadd.f32 %v2742_v38, %v2612_v9  ;;  %v1854_v44 = vpop.f32.mrb[1].mxu0 }
 0x169   : > { %v2767_v47 = vadd.f32 %v1854_v44, %v990_v15 }
 0x16a   : > { %1951 = vst.msk [vmem:[%s3761_s9 + $0x8] sm:$0xff] %vm1949_vm4, %v2766_v42  ;;  %v1967_v48 = vsel %vm1949_vm4, %v2766_v42, 0.0  ;;  %v2004_v51 = vmul.f32 %v2766_v42, %v2766_v42 }
 0x16b   : > { %1950 = vst.msk [vmem:[%s3761_s9] sm:$0xff] %vm1949_vm4, %v2767_v47  ;;  %v1966_v54 = vsel %vm1949_vm4, %v2767_v47, 0.0  ;;  %v2003_v55 = vmul.f32 %v2767_v47, %v2767_v47  ;;  %v2745_v56 = vpop.f32.mrb[2].mxu0 }
 0x16c   : > { %v2020_v0 = vsel %vm1949_vm4, %v2004_v51, 0.0  ;;  %v1968_v2 = vadd.f32 %v1967_v48, %v1966_v54  ;;  %v2768_v10 = vadd.f32 %v2745_v56, %v2615_v18  ;;  %v1864_v12 = vpop.f32.mrb[3].mxu0 }
 0x16d   : > { %v2019_v13 = vsel %vm1949_vm4, %v2003_v55, 0.0  ;;  %v2769_v14 = vadd.f32 %v1864_v12, %v1000_v25 }
 0x16e   : > { %v2021_v16 = vadd.f32 %v2020_v0, %v2019_v13  ;;  %1953 = vst.msk [vmem:[%s3761_s9 + $0x18] sm:$0xff] %vm1949_vm4, %v2768_v10  ;;  %v2006_v17 = vmul.f32 %v2768_v10, %v2768_v10  ;;  %v1971_v58 = vsel %vm1949_vm4, %v2768_v10, 0.0 }
 0x16f   : > { %1952 = vst.msk [vmem:[%s3761_s9 + $0x10] sm:$0xff] %vm1949_vm4, %v2769_v14  ;;  %v1969_v21 = vsel %vm1949_vm4, %v2769_v14, 0.0  ;;  %v2005_v23 = vmul.f32 %v2769_v14, %v2769_v14  ;;  %v2748_v30 = vpop.f32.mrb[4].mxu0 }
 0x170   : > { %v1970_v33 = vadd.f32 %v1969_v21, %v1968_v2  ;;  %v2770_v50 = vadd.f32 %v2748_v30, %v2618_v26  ;;  %v1874_v53 = vpop.f32.mrb[5].mxu0  ;;  %v2024_v41 = vsel %vm1949_vm4, %v2006_v17, 0.0 }
 0x171   : > { %v2022_v59 = vsel %vm1949_vm4, %v2005_v23, 0.0  ;;  %v2771_v60 = vadd.f32 %v1874_v53, %v1010_v31 }
 0x172   : > { %v2023_v3 = vadd.f32 %v2022_v59, %v2021_v16  ;;  %1955 = vst.msk [vmem:[%s3761_s9 + $0x28] sm:$0xff] %vm1949_vm4, %v2770_v50  ;;  %v1972_v62 = vadd.f32 %v1971_v58, %v1970_v33  ;;  %v2008_v7 = vmul.f32 %v2770_v50, %v2770_v50  ;;  %v1975_v61 = vsel %vm1949_vm4, %v2770_v50, 0.0 }
 0x173   : > { %1954 = vst.msk [vmem:[%s3761_s9 + $0x20] sm:$0xff] %vm1949_vm4, %v2771_v60  ;;  %v1973_v24 = vsel %vm1949_vm4, %v2771_v60, 0.0  ;;  %v2007_v49 = vmul.f32 %v2771_v60, %v2771_v60  ;;  %v2751_v39 = vpop.f32.mrb[6].mxu0 }
 0x174   : > { %v1974_v45 = vadd.f32 %v1973_v24, %v1972_v62  ;;  %v2025_v46 = vadd.f32 %v2024_v41, %v2023_v3  ;;  %v2772_v52 = vadd.f32 %v2751_v39, %v2621_v32  ;;  %v1884_v63 = vpop.f32.mrb[7].mxu0  ;;  %v2028_v28 = vsel %vm1949_vm4, %v2008_v7, 0.0 }
 0x175   : > { %v2026_v19 = vsel %vm1949_vm4, %v2007_v49, 0.0  ;;  %v2773_v35 = vadd.f32 %v1884_v63, %v1020_v36 }
 0x176   : > { %v2027_v20 = vadd.f32 %v2026_v19, %v2025_v46  ;;  %1957 = vst.msk [vmem:[%s3761_s9 + $0x38] sm:$0xff] %vm1949_vm4, %v2772_v52  ;;  %v1976_v40 = vadd.f32 %v1975_v61, %v1974_v45  ;;  %v2650_v22 = vpop.f32.mrb[8].mxu1  ;;  %v2010_v29 = vmul.f32 %v2772_v52, %v2772_v52  ;;  %v1979_v6 = vsel %vm1949_vm4, %v2772_v52, 0.0 }
 0x177   : > { %1956 = vst.msk [vmem:[%s3761_s9 + $0x30] sm:$0xff] %vm1949_vm4, %v2773_v35  ;;  %v1977_v37 = vsel %vm1949_vm4, %v2773_v35, 0.0  ;;  %v2009_v27 = vmul.f32 %v2773_v35, %v2773_v35  ;;  %v2754_v8 = vpop.f32.mrb[8].mxu0  ;;  %v1204_v43 = vpop.f32.mrb[9].mxu1 }
 0x178   : > { %v1978_v57 = vadd.f32 %v1977_v37, %v1976_v40  ;;  %v2029_v4 = vadd.f32 %v2028_v28, %v2027_v20  ;;  %v2774_v5 = vadd.f32 %v2754_v8, %v2650_v22  ;;  %v1894_v11 = vpop.f32.mrb[9].mxu0  ;;  %v2032_v25 = vsel %vm1949_vm4, %v2010_v29, 0.0 }
 0x179   : > { %v2030_v34 = vsel %vm1949_vm4, %v2009_v27, 0.0  ;;  %v2775_v1 = vadd.f32 %v1894_v11, %v1204_v43 }
 0x17a   : > { %v2031_v9 = vadd.f32 %v2030_v34, %v2029_v4  ;;  %1959 = vst.msk [vmem:[%s3761_s9 + $0x48] sm:$0xff] %vm1949_vm4, %v2774_v5  ;;  %v1980_v15 = vadd.f32 %v1979_v6, %v1978_v57  ;;  %v2653_v18 = vpop.f32.mrb[10].mxu1  ;;  %v2012_v26 = vmul.f32 %v2774_v5, %v2774_v5  ;;  %v1983_v51 = vsel %vm1949_vm4, %v2774_v5, 0.0 }
 0x17b   : > { %1958 = vst.msk [vmem:[%s3761_s9 + $0x40] sm:$0xff] %vm1949_vm4, %v2775_v1  ;;  %v1981_v31 = vsel %vm1949_vm4, %v2775_v1, 0.0  ;;  %v2011_v32 = vmul.f32 %v2775_v1, %v2775_v1  ;;  %v2757_v36 = vpop.f32.mrb[10].mxu0  ;;  %v1214_v38 = vpop.f32.mrb[11].mxu1 }
 0x17c   : > { %v1982_v42 = vadd.f32 %v1981_v31, %v1980_v15  ;;  %v2033_v44 = vadd.f32 %v2032_v25, %v2031_v9  ;;  %v2776_v47 = vadd.f32 %v2757_v36, %v2653_v18  ;;  %v1904_v48 = vpop.f32.mrb[11].mxu0  ;;  %v2036_v10 = vsel %vm1949_vm4, %v2012_v26, 0.0 }
 0x17d   : > { %v2034_v54 = vsel %vm1949_vm4, %v2011_v32, 0.0  ;;  %v2777_v55 = vadd.f32 %v1904_v48, %v1214_v38 }
 0x17e   : > { %v2035_v56 = vadd.f32 %v2034_v54, %v2033_v44  ;;  %1961 = vst.msk [vmem:[%s3761_s9 + $0x58] sm:$0xff] %vm1949_vm4, %v2776_v47  ;;  %v1984_v0 = vadd.f32 %v1983_v51, %v1982_v42  ;;  %v2656_v2 = vpop.f32.mrb[12].mxu1  ;;  %v2014_v12 = vmul.f32 %v2776_v47, %v2776_v47  ;;  %v1987_v50 = vsel %vm1949_vm4, %v2776_v47, 0.0 }
 0x17f   : > { %1960 = vst.msk [vmem:[%s3761_s9 + $0x50] sm:$0xff] %vm1949_vm4, %v2777_v55  ;;  %v1985_v13 = vsel %vm1949_vm4, %v2777_v55, 0.0  ;;  %v2013_v14 = vmul.f32 %v2777_v55, %v2777_v55  ;;  %v2760_v16 = vpop.f32.mrb[12].mxu0  ;;  %v1224_v17 = vpop.f32.mrb[13].mxu1 }
 0x180   : > { %v1986_v21 = vadd.f32 %v1985_v13, %v1984_v0  ;;  %v2037_v23 = vadd.f32 %v2036_v10, %v2035_v56  ;;  %v2778_v30 = vadd.f32 %v2760_v16, %v2656_v2  ;;  %v1914_v33 = vpop.f32.mrb[13].mxu0  ;;  %v2040_v62 = vsel %vm1949_vm4, %v2014_v12, 0.0 }
 0x181   : > { %v2038_v53 = vsel %vm1949_vm4, %v2013_v14, 0.0  ;;  %v2779_v58 = vadd.f32 %v1914_v33, %v1224_v17 }
 0x182   : > { %v2039_v59 = vadd.f32 %v2038_v53, %v2037_v23  ;;  %1963 = vst.msk [vmem:[%s3761_s9 + $0x68] sm:$0xff] %vm1949_vm4, %v2778_v30  ;;  %v1988_v60 = vadd.f32 %v1987_v50, %v1986_v21  ;;  %v2659_v3 = vpop.f32.mrb[14].mxu1  ;;  %v2016_v41 = vmul.f32 %v2778_v30, %v2778_v30  ;;  %v1991_v61 = vsel %vm1949_vm4, %v2778_v30, 0.0 }
 0x183   : > { %1962 = vst.msk [vmem:[%s3761_s9 + $0x60] sm:$0xff] %vm1949_vm4, %v2779_v58  ;;  %v1989_v7 = vsel %vm1949_vm4, %v2779_v58, 0.0  ;;  %v2015_v24 = vmul.f32 %v2779_v58, %v2779_v58  ;;  %v2763_v49 = vpop.f32.mrb[14].mxu0  ;;  %v1234_v39 = vpop.f32.mrb[15].mxu1 }
 0x184   : > { %v1990_v45 = vadd.f32 %v1989_v7, %v1988_v60  ;;  %v2041_v46 = vadd.f32 %v2040_v62, %v2039_v59  ;;  %v2780_v52 = vadd.f32 %v2763_v49, %v2659_v3  ;;  %v1924_v63 = vpop.f32.mrb[15].mxu0  ;;  %v2044_v22 = vsel %vm1949_vm4, %v2016_v41, 0.0 }
 0x185   : > { %v2042_v19 = vsel %vm1949_vm4, %v2015_v24, 0.0  ;;  %v2781_v35 = vadd.f32 %v1924_v63, %v1234_v39 }
 0x186   : > { %v2043_v20 = vadd.f32 %v2042_v19, %v2041_v46  ;;  %1965 = vst.msk [vmem:[%s3761_s9 + $0x78] sm:$0xff] %vm1949_vm4, %v2780_v52  ;;  %v1992_v40 = vadd.f32 %v1991_v61, %v1990_v45  ;;  %v2018_v28 = vmul.f32 %v2780_v52, %v2780_v52  ;;  %v1995_v43 = vsel %vm1949_vm4, %v2780_v52, 0.0 }
 0x187   : > { %1964 = vst.msk [vmem:[%s3761_s9 + $0x70] sm:$0xff] %vm1949_vm4, %v2781_v35  ;;  %v1993_v29 = vsel %vm1949_vm4, %v2781_v35, 0.0  ;;  %v2017_v37 = vmul.f32 %v2781_v35, %v2781_v35 }
 0x188   : > { %v1994_v27 = vadd.f32 %v1993_v29, %v1992_v40  ;;  %v2045_v8 = vadd.f32 %v2044_v22, %v2043_v20  ;;  %v2048_v11 = vsel %vm1949_vm4, %v2018_v28, 0.0 }
 0x189   : > { %v2046_v57 = vsel %vm1949_vm4, %v2017_v37, 0.0 }
 0x18a   : > { %v1996_v4 = vadd.f32 %v1995_v43, %v1994_v27  ;;  %v2047_v5 = vadd.f32 %v2046_v57, %v2045_v8 }
 0x18c   : > { %v1997_v6 = vrot.slane %v1996_v4, 4  ;;  %v2049_v34 = vadd.f32 %v2048_v11, %v2047_v5 }
 0x18e   : > { %v1998_v1 = vadd.f32 %v1997_v6, %v1996_v4  ;;  %v2050_v9 = vrot.slane %v2049_v34, 4 }
 0x190   : > { %v1999_v15 = vrot.slane %v1998_v1, 2  ;;  %v2051_v18 = vadd.f32 %v2050_v9, %v2049_v34 }
 0x192   : > { %v2000_v25 = vadd.f32 %v1999_v15, %v1998_v1  ;;  %v2052_v26 = vrot.slane %v2051_v18, 2 }
 0x194   : > { %v2001_v31 = vrot.slane %v2000_v25, 1  ;;  %v2053_v32 = vadd.f32 %v2052_v26, %v2051_v18 }
 0x196   : > { %v2054_v36 = vrot.slane %v2053_v32, 1  ;;  %v2002_v38 = vadd.f32 %v2001_v31, %v2000_v25 }
 0x198   : > { %v2055_v42 = vadd.f32 %v2054_v36, %v2053_v32 }
 0x19a   : > { %v2057_v44 = vsel %vm2056_vm5, %v2002_v38, %v2055_v42 }
 0x19b   : > { %2059 = vst.msk [vmem:[%s192_s27] sm:$0x3] %vm2058_vm6, %v2057_v44 }
 0x19c   : > { %2979 = shalt.err (!%p2976_p7)
}
 0x19d   : > { %s2980_s9 = scalar_lea.hbm %s3833_s5, 32  ;;  %s2984_s20 = scalar_lea.hbm %s3889_s3, 128 }
 0x19e   : > { %p2981_p9 = scmp.ne.s32.totalorder %s3833_s5, %s2980_s9  ;;  %p2985_p12 = scmp.lt.u32.totalorder %s3833_s5, %s3889_s3 }
 0x19f   : > { %p2986_p13 = scmp.lt.u32.totalorder %s2984_s20, %s2980_s9  ;;  %p2988_p1 = scmp.lt.u32.totalorder %s2980_s9, %s3833_s5 }
 0x1a0   : > { %p2982_p10 = pnand %p2981_p9, %p3134_p3 }
 0x1a1   : > { %p2987_p0 = por %p2986_p13, %p2985_p12 }
 0x1a2   : > { %p2983_p11 = pneg %p2982_p10 }
 0x1a3   : > { %p2989_p2 = por %p2988_p1, %p2987_p0 }
 0x1a5   : > { %p2990_p4 = pnand %p2989_p2, %p2983_p11 }
 0x1a7   : > { %2993 = shalt.err (!%p2990_p4)
}
 0x1a8   : > { %2895 = dma.vmem_to_hbm [thread:$0]  (%p3134_p3), %s3835_s28, 32, %s3833_s5, %s2071_s15  }
 0x1a9 PF: > { %p2901_p5 = scmp.ge.s32.totalorder %s3060_s19, 2  ;;  %s2115_s27 = sand.u32 1, %s3032_s12  }
 0x1aa   : > { %s2116_s29 = scalar_lea.sflag [#allocation3], %s2115_s27 }
 0x1ab   : > { %p2898_p6 = pnand %p2901_p5, %p3143_p8 }
 0x1ad   : > { %3027 = dma.done.wait (!%p2898_p6), %s2116_s29, 32  }
 0x1ae   : > { %3029 = vsyncadd (!%p2898_p6), %s2116_s29, 4294967264  ;;  %s17_s19 = sadd.s32 1, %s3060_s19   ;;  %s3892_s12 = smov %s3036_s13 }
 0x1af   : > { %p14_p7 = scmp.ge.s32.totalorder %s17_s19, 6   ;;  %s3893_s13 = smov %s3040_s14 }
 0x1b0   : > { %s3894_s14 = smov %s3152_s30  ;;  %s3895_s15 = smov %s3052_s17 }
 0x1b1   : > { %s3896_s16 = smov %s3056_s18  ;;  %s3897_s17 = smov %s3900_s22 }
 0x1b2   : > { %s3898_s18 = smov %s3904_s23  ;;  %16 = sbr.rel (!%p14_p7) target bundleno = 5 (0x5), region = 76 }
 0x1b9   :  { %2121 = vsyncpa [#allocation3], 1 }
 0x1ba   :  { %2123 = vsyncpa [#allocation3 + $0x1], 1 }

</bundles_post_ra>
